<compile_context>
chip_gen: v6e
topology: v6e:2x2x1
jax: 0.10.0
libtpu: 0.0.40
codegen_flags: <defaults>
</compile_context>

<pallas_src>
import jax
import jax.numpy as jnp
from jax import lax
from jax.experimental import pallas as pl
from jax.experimental.pallas import tpu as pltpu


def _round_up(x: int, m: int) -> int:
    return ((x + m - 1) // m) * m


def _cdiv(a: int, b: int) -> int:
    return (a + b - 1) // b


def _mlp_kernel(x_ref, w1_ref, b1_ref, w2_ref, b2_ref, w3_ref, b3_ref, oT_ref):
    # x_ref: (tile_b, obs) in the native PyTorch layout.  Fold the transpose
    # into the first matmul (contract the minor dims of both operands) so the
    # lane-dense transposed activation (16, tile_b) comes straight off the MXU.
    t = lax.dot_general(
        w1_ref[...], x_ref[...],
        dimension_numbers=(((1,), (1,)), ((), ())),
        preferred_element_type=jnp.float32)                           # (16, TB)
    t = jnp.maximum(t + b1_ref[...], 0.0)

    # Layer 2: (32, 16) @ (16, TB) + (32, 1), ReLU
    t = jnp.dot(w2_ref[...], t, preferred_element_type=jnp.float32)   # (32, TB)
    t = jnp.maximum(t + b2_ref[...], 0.0)

    # Layer 3: (act, 32) @ (32, TB) + (act, 1)
    t = jnp.dot(w3_ref[...], t, preferred_element_type=jnp.float32)   # (act, TB)
    oT_ref[...] = (t + b3_ref[...]).astype(oT_ref.dtype)


def _choose_tile(batch: int, max_tile_b: int) -> int:
    """Grid-first tile selection (review items on tile size / padding / v7x)."""
    grid_b = _cdiv(batch, max_tile_b)
    if batch >= 256:                  # enough rows to feed both v7x TensorCores
        grid_b = max(grid_b, 2)
        if grid_b % 2:                # even step count for 2-core sharding
            grid_b += 1
    if grid_b <= 1:
        return batch                  # full-extent block: always legal, exact
    return _round_up(_cdiv(batch, grid_b), 128)


def dqn_forward(state, params, *, max_tile_b=8192):
    """state: (B, obs) f32.  params: PyTorch layout -- W (out, in), b (out,).
    Returns (B, act) f32, identical semantics to Model.forward."""
    w1, b1 = params["w1"], params["b1"]      # (16, obs), (16,)
    w2, b2 = params["w2"], params["b2"]      # (32, 16),  (32,)
    w3, b3 = params["w3"], params["b3"]      # (act, 32), (act,)

    B, obs = state.shape
    act = w3.shape[0]

    # Tiny column-vector biases for the transposed (feature, batch) compute.
    b1c = b1.reshape(-1, 1)
    b2c = b2.reshape(-1, 1)
    b3c = b3.reshape(-1, 1)

    tile_b = _choose_tile(B, max_tile_b)
    grid_b = _cdiv(B, tile_b)

    flops = 2 * B * (obs * 16 + 16 * 32 + 32 * act)
    bytes_accessed = 4 * (B * (obs + act) + w1.size + b1.size
                          + w2.size + b2.size + w3.size + b3.size)

    def resident(shape):
        # Same block every grid step -> fetched once, stays VMEM-resident.
        return pl.BlockSpec(shape, lambda i: (0, 0))

    outT = pl.pallas_call(
        _mlp_kernel,
        out_shape=jax.ShapeDtypeStruct((act, B), jnp.float32),
        grid=(grid_b,),
        in_specs=[
            pl.BlockSpec((tile_b, obs), lambda i: (i, 0)),   # streamed x tile (native)
            resident(w1.shape), resident(b1c.shape),
            resident(w2.shape), resident(b2c.shape),
            resident(w3.shape), resident(b3c.shape),
        ],
        out_specs=pl.BlockSpec((act, tile_b), lambda i: (0, i)),
        compiler_params=pltpu.CompilerParams(
            dimension_semantics=("parallel",),
            vmem_limit_bytes=32 * 1024 * 1024,
        ),
        cost_estimate=pl.CostEstimate(
            flops=flops, transcendentals=0, bytes_accessed=bytes_accessed),
    )(state, w1, b1c, w2, b2c, w3, b3c)

    # (act, B) -> (B, act): the remaining small transpose is folded into the
    # consumer (review-sanctioned); it only touches the act-wide output side.
    return outT.T


def make_params(key, obs_shape, act_shape):
    """Deterministic synthetic parameters in PyTorch nn.Linear layout:
    W is (out, in), b is (out,)."""
    ks = jax.random.split(key, 6)

    def lin(kw, kb, fan_in, fan_out):
        bound = 1.0 / jnp.sqrt(fan_in)
        w = jax.random.uniform(kw, (fan_out, fan_in), jnp.float32, -bound, bound)
        b = jax.random.uniform(kb, (fan_out,), jnp.float32, -bound, bound)
        return w, b

    w1, b1 = lin(ks[0], ks[1], obs_shape, 16)
    w2, b2 = lin(ks[2], ks[3], 16, 32)
    w3, b3 = lin(ks[4], ks[5], 32, act_shape)
    return {"w1": w1, "b1": b1, "w2": w2, "b2": b2, "w3": w3, "b3": b3}


def _reference(state, p):
    t = jnp.maximum(state @ p["w1"].T + p["b1"], 0.0)
    t = jnp.maximum(t @ p["w2"].T + p["b2"], 0.0)
    return t @ p["w3"].T + p["b3"]


if __name__ == "__main__":
    key = jax.random.PRNGKey(0)
    k_x1, k_x2, k_p = jax.random.split(key, 3)

    obs_shape, act_shape = 8, 4
    params = make_params(k_p, obs_shape, act_shape)

    # Case 1: tiny inference batch (B=4) -> single exact full-extent block.
    state_small = jax.random.normal(k_x1, (4, obs_shape), jnp.float32)
    out_small = dqn_forward(state_small, params)
    jax.block_until_ready(out_small)
    ref_small = _reference(state_small, params)
    assert out_small.shape == (4, act_shape)
    assert jnp.allclose(out_small, ref_small, atol=1e-5, rtol=1e-5)

    # Case 2: batch not divisible by the tile -> 2 grid steps (megacore split)
    # with a ragged final block (exercises the no-explicit-padding path).
    state_big = jax.random.normal(k_x2, (300, obs_shape), jnp.float32)
    out_big = dqn_forward(state_big, params)
    jax.block_until_ready(out_big)
    ref_big = _reference(state_big, params)
    assert out_big.shape == (300, act_shape)
    assert jnp.allclose(out_big, ref_big, atol=1e-5, rtol=1e-5)

    print("KERNEL_OK")
</pallas_src>

<mosaic_0001>
module attributes {stable_mosaic.version = 11 : i64} {
  func.func @_mlp_kernel(%arg0: i32, %arg1: memref<4x8xf32, #tpu.memory_space<vmem>>, %arg2: memref<16x8xf32, #tpu.memory_space<vmem>>, %arg3: memref<16x1xf32, #tpu.memory_space<vmem>>, %arg4: memref<32x16xf32, #tpu.memory_space<vmem>>, %arg5: memref<32x1xf32, #tpu.memory_space<vmem>>, %arg6: memref<4x32xf32, #tpu.memory_space<vmem>>, %arg7: memref<4x1xf32, #tpu.memory_space<vmem>>, %arg8: memref<4x4xf32, #tpu.memory_space<vmem>>) attributes {dimension_semantics = [#tpu.dimension_semantics<parallel>], iteration_bounds = array<i64: 1>, scalar_prefetch = 0 : i64, scratch_operands = 0 : i64, tpu.core_type = #tpu.core_type<tc>, window_params = [{transform_indices = @transform_0, window_bounds = array<i64: 4, 8>}, {pipeline_mode = #tpu.pipeline_mode<synchronous>, transform_indices = @transform_1, window_bounds = array<i64: 16, 8>}, {pipeline_mode = #tpu.pipeline_mode<synchronous>, transform_indices = @transform_2, window_bounds = array<i64: 16, 1>}, {pipeline_mode = #tpu.pipeline_mode<synchronous>, transform_indices = @transform_3, window_bounds = array<i64: 32, 16>}, {pipeline_mode = #tpu.pipeline_mode<synchronous>, transform_indices = @transform_4, window_bounds = array<i64: 32, 1>}, {pipeline_mode = #tpu.pipeline_mode<synchronous>, transform_indices = @transform_5, window_bounds = array<i64: 4, 32>}, {pipeline_mode = #tpu.pipeline_mode<synchronous>, transform_indices = @transform_6, window_bounds = array<i64: 4, 1>}, {transform_indices = @transform_7, window_bounds = array<i64: 4, 4>}]} {
    %c0 = arith.constant 0 : index
    %c0_0 = arith.constant 0 : index
    %0 = vector.load %arg2[%c0, %c0_0] : memref<16x8xf32, #tpu.memory_space<vmem>>, vector<16x8xf32>
    %c0_1 = arith.constant 0 : index
    %c0_2 = arith.constant 0 : index
    %1 = vector.load %arg1[%c0_1, %c0_2] : memref<4x8xf32, #tpu.memory_space<vmem>>, vector<4x8xf32>
    %cst = arith.constant dense<0.000000e+00> : vector<16x4xf32>
    %2 = tpu.matmul %0, %1, %cst {dimension_numbers = #tpu.dot_dimension_numbers<[1], [1], [0], [0], [0, 0, 1, 0], [], []>} : vector<16x8xf32>, vector<4x8xf32>, vector<16x4xf32> -> vector<16x4xf32>
    %c0_3 = arith.constant 0 : index
    %c0_4 = arith.constant 0 : index
    %3 = vector.load %arg3[%c0_3, %c0_4] : memref<16x1xf32, #tpu.memory_space<vmem>>, vector<16x1xf32>
    %4 = vector.broadcast %3 : vector<16x1xf32> to vector<16x4xf32>
    %5 = arith.addf %2, %4 : vector<16x4xf32>
    %cst_5 = arith.constant 0.000000e+00 : f32
    %6 = vector.broadcast %cst_5 : f32 to vector<16x4xf32>
    %7 = arith.maximumf %5, %6 : vector<16x4xf32>
    %c0_6 = arith.constant 0 : index
    %c0_7 = arith.constant 0 : index
    %8 = vector.load %arg4[%c0_6, %c0_7] : memref<32x16xf32, #tpu.memory_space<vmem>>, vector<32x16xf32>
    %cst_8 = arith.constant dense<0.000000e+00> : vector<32x4xf32>
    %9 = tpu.matmul %8, %7, %cst_8 {dimension_numbers = #tpu.dot_dimension_numbers<[1], [0], [0], [1], [0, 0, 1, 1], [], []>} : vector<32x16xf32>, vector<16x4xf32>, vector<32x4xf32> -> vector<32x4xf32>
    %c0_9 = arith.constant 0 : index
    %c0_10 = arith.constant 0 : index
    %10 = vector.load %arg5[%c0_9, %c0_10] : memref<32x1xf32, #tpu.memory_space<vmem>>, vector<32x1xf32>
    %11 = vector.broadcast %10 : vector<32x1xf32> to vector<32x4xf32>
    %12 = arith.addf %9, %11 : vector<32x4xf32>
    %cst_11 = arith.constant 0.000000e+00 : f32
    %13 = vector.broadcast %cst_11 : f32 to vector<32x4xf32>
    %14 = arith.maximumf %12, %13 : vector<32x4xf32>
    %c0_12 = arith.constant 0 : index
    %c0_13 = arith.constant 0 : index
    %15 = vector.load %arg6[%c0_12, %c0_13] : memref<4x32xf32, #tpu.memory_space<vmem>>, vector<4x32xf32>
    %cst_14 = arith.constant dense<0.000000e+00> : vector<4x4xf32>
    %16 = tpu.matmul %15, %14, %cst_14 {dimension_numbers = #tpu.dot_dimension_numbers<[1], [0], [0], [1], [0, 0, 1, 1], [], []>} : vector<4x32xf32>, vector<32x4xf32>, vector<4x4xf32> -> vector<4x4xf32>
    %c0_15 = arith.constant 0 : index
    %c0_16 = arith.constant 0 : index
    %17 = vector.load %arg7[%c0_15, %c0_16] : memref<4x1xf32, #tpu.memory_space<vmem>>, vector<4x1xf32>
    %18 = vector.broadcast %17 : vector<4x1xf32> to vector<4x4xf32>
    %19 = arith.addf %16, %18 : vector<4x4xf32>
    %c0_17 = arith.constant 0 : index
    %c0_18 = arith.constant 0 : index
    %20 = vector.load %arg8[%c0_17, %c0_18] : memref<4x4xf32, #tpu.memory_space<vmem>>, vector<4x4xf32>
    tpu.vector_store %arg8[%c0_17, %c0_18], %19 {strides = array<i32>} : memref<4x4xf32, #tpu.memory_space<vmem>>, vector<4x4xf32>,
    return
  }
  func.func @transform_0(%arg0: i32) -> (i32, i32) {
    %c0_i32 = arith.constant 0 : i32
    %c0_i32_0 = arith.constant 0 : i32
    return %arg0, %c0_i32 : i32, i32
  }
  func.func @transform_1(%arg0: i32) -> (i32, i32) {
    %c0_i32 = arith.constant 0 : i32
    %c0_i32_0 = arith.constant 0 : i32
    %c0_i32_1 = arith.constant 0 : i32
    return %c0_i32, %c0_i32_0 : i32, i32
  }
  func.func @transform_2(%arg0: i32) -> (i32, i32) {
    %c0_i32 = arith.constant 0 : i32
    %c0_i32_0 = arith.constant 0 : i32
    %c0_i32_1 = arith.constant 0 : i32
    return %c0_i32, %c0_i32_0 : i32, i32
  }
  func.func @transform_3(%arg0: i32) -> (i32, i32) {
    %c0_i32 = arith.constant 0 : i32
    %c0_i32_0 = arith.constant 0 : i32
    %c0_i32_1 = arith.constant 0 : i32
    return %c0_i32, %c0_i32_0 : i32, i32
  }
  func.func @transform_4(%arg0: i32) -> (i32, i32) {
    %c0_i32 = arith.constant 0 : i32
    %c0_i32_0 = arith.constant 0 : i32
    %c0_i32_1 = arith.constant 0 : i32
    return %c0_i32, %c0_i32_0 : i32, i32
  }
  func.func @transform_5(%arg0: i32) -> (i32, i32) {
    %c0_i32 = arith.constant 0 : i32
    %c0_i32_0 = arith.constant 0 : i32
    %c0_i32_1 = arith.constant 0 : i32
    return %c0_i32, %c0_i32_0 : i32, i32
  }
  func.func @transform_6(%arg0: i32) -> (i32, i32) {
    %c0_i32 = arith.constant 0 : i32
    %c0_i32_0 = arith.constant 0 : i32
    %c0_i32_1 = arith.constant 0 : i32
    return %c0_i32, %c0_i32_0 : i32, i32
  }
  func.func @transform_7(%arg0: i32) -> (i32, i32) {
    %c0_i32 = arith.constant 0 : i32
    %c0_i32_0 = arith.constant 0 : i32
    return %c0_i32, %arg0 : i32, i32
  }
}

</mosaic_0001>

<bundles_post_ra>
// kernel: tpu_custom_call.1
= control target key start
LH: loop header
LB: loop body
LE: loop exit
PB: predicated region body
PF: predicated region fallthrough
CT: control target
= control target key end

     0   :  { %vm42_vm0 = vcmask 64512   ;;  %v432_v4 = vmov 0   ;;  %s528_s0 = inlined_call_operand.vmem [shape: f32[4,8], index: 0, kind: input, shape index: {}]   ;;  %s529_s1 = inlined_call_operand.vmem [shape: f32[16,8], index: 1, kind: input, shape index: {}]   ;;  %s530_s2 = inlined_call_operand.vmem [shape: f32[16,1], index: 2, kind: input, shape index: {}]   ;;  %s531_s3 = inlined_call_operand.vmem [shape: f32[32,16], index: 3, kind: input, shape index: {}]   ;;  %s532_s4 = inlined_call_operand.vmem [shape: f32[32,1], index: 4, kind: input, shape index: {}]   ;;  %s533_s5 = inlined_call_operand.vmem [shape: f32[4,32], index: 5, kind: input, shape index: {}]   ;;  %s534_s6 = inlined_call_operand.vmem [shape: f32[4,1], index: 6, kind: input, shape index: {}]   ;;  %s535_s7 = inlined_call_operand.hbm [shape: f32[4,4], index: 7, kind: output, shape index: {}]  }
   0x1   :  { %v29_v0 = vld [vmem:[%s528_s0] sm:$0xf]  ;;  %v31_v2 = vld [vmem:[%s530_s2 + $0x8] sm:$0xff]  ;;  %408 = vset.pattern.permute.xlu0 %v432_v4 }
   0x2   :  { %v27_v1 = vld [vmem:[%s529_s1] sm:$0xff]  ;;  %378 = vmatprep.subr.msk.mxu0 %vm42_vm0, %v29_v0  ;;  %v28_v3 = vld [vmem:[%s529_s1 + $0x8] sm:$0xff] }
   0x3   :  { %380 = vmatprep.mubr.msk.f32.mxu0 %vm42_vm0, %v27_v1  ;;  %379 = vmatpush3.xpose.msk.msra.mxu0 %vm42_vm0, %v29_v0 }
   0x4   :  { %12 = vsyncpa [#allocation3], 0  ;;  %39 = vperm.xlu0 %408, %v31_v2   ;;  %409 = vset.pattern.permute.xlu1 %v432_v4  ;;  %v30_v5 = vld [vmem:[%s530_s2] sm:$0xff]  ;;  %v134_v6 = vld [vmem:[%s532_s4 + $0x8] sm:$0xff]  ;;  %vm157_vm1 = vcmask 130048   ;;  %v433_v23 = vmov 0.0  }
   0x5   :  { %v260_v7 = vld [vmem:[%s534_s6] sm:$0xf]  ;;  %v136_v9 = vld [vmem:[%s532_s4 + $0x18] sm:$0xff]  ;;  %v135_v10 = vld [vmem:[%s532_s4 + $0x10] sm:$0xff]  ;;  %393 = vmatprep.subr.mxu0 %v433_v23  ;;  %vm434_vm2 = vmmov 0   ;;  %vm266_vm3 = vcmask 261120  }
   0x6   :  { %381 = vmatmul.mubr.msk.f32.vlgmr.msra.gmra.mxu0 %vm42_vm0, %v28_v3  ;;  %v129_v8 = vld [vmem:[%s531_s3] sm:$0xff]  ;;  %154 = vperm.xlu1 %409, %v136_v9   ;;  %v130_v20 = vld [vmem:[%s531_s3 + $0x8] sm:$0xff]  ;;  %v131_v21 = vld [vmem:[%s531_s3 + $0x10] sm:$0xff]  ;;  %s435_s25 = smov [#allocation2]   ;;  %vm340_vm4 = vcmask 27648  }
   0x7   :  { %387 = vmatprep.mubr.msk.f32.mxu1 %vm157_vm1, %v129_v8  ;;  %v133_v11 = vld [vmem:[%s532_s4] sm:$0xff]  ;;  %v132_v22 = vld [vmem:[%s531_s3 + $0x18] sm:$0xff]  ;;  %401 = vmatprep.mubr.msk.f32.mxu0 %vm434_vm2, %v433_v23  ;;  %s348_s26 = sshll.u32 %s435_s25, 4  ;;  %s349_s26 = int_to_ptr.vmem [resolvable:$true] %s348_s26 }
   0x8   :  { %34 = vperm.xlu0 %408, %v30_v5   ;;  %v259_v40 = vld [vmem:[%s533_s5] sm:$0xf]  ;;  %s410_s27 = scalar_lea.vmem %s349_s26, 64  ;;  %p415_p1 = scmp.lt.s32.totalorder %s349_s26, %s349_s26 }
   0x9   :  { %p411_p0 = scmp.ne.s32.totalorder %s349_s26, %s410_s27  ;;  %p416_p2 = scmp.lt.s32.totalorder %s410_s27, %s410_s27 }
   0xa   :  { %149 = vperm.xlu1 %409, %v135_v10  }
   0xb   :  { %p417_p3 = por %p416_p2, %p415_p1 }
   0xc   :  { %144 = vperm.xlu0 %408, %v134_v6  }
   0xd   :  { %p418_p4 = pnand %p417_p3, %p411_p0 }
   0xe   :  { %139 = vperm.xlu1 %409, %v133_v11  }
  0x10   :  { %263 = vperm.xlu0 %408, %v260_v7  }
  0x7f   :  { %v40_v12 = vpop.permute.xlu0 %39 }
  0x81   :  { %v155_v24 = vpop.permute.xlu1 %154 }
  0x83   :  { %v35_v15 = vpop.permute.xlu0 %34 }
  0x85   :  { %v150_v25 = vpop.permute.xlu1 %149 }
  0x87   :  { %v145_v29 = vpop.permute.xlu0 %144 }
  0x89   :  { %v140_v31 = vpop.permute.xlu1 %139 }
  0x8b   :  { %v264_v41 = vpop.permute.xlu0 %263 }
  0xc6   :  { %v382_v13 = vpop.f32.mrf.mxu0 }
  0xc7   :  { %v124_v14 = vadd.f32 %v382_v13, %v40_v12 }
  0xc8   :  { %v118_v16 = vpop.f32.mrf.mxu0 }
  0xc9   :  { %v128_v17 = vmax.f32 %v124_v14, 0.0  ;;  %v119_v18 = vadd.f32 %v118_v16, %v35_v15 }
  0xcb   :  { %v127_v19 = vmax.f32 %v119_v18, 0.0  ;;  %383 = vmatprep.subr.mxu1 %v128_v17 }
  0xcc   :  { %384 = vmatpush3.msra.mxu1 %v128_v17 }
  0xcd   :  { %385 = vmatprep.subr.mxu1 %v127_v19 }
  0xce   :  { %386 = vmatpush3.msra.mxu1 %v127_v19 }
  0xcf   :  { %388 = vmatmul.mubr.msk.f32.vlgmr.msra.gmra.mxu1 %vm157_vm1, %v130_v20 }
  0xd0   :  { %390 = vmatprep.mubr.msk.f32.mxu1 %vm157_vm1, %v131_v21 }
  0xd3   :  { %391 = vmatmul.mubr.msk.f32.gmra.mxu1 %vm157_vm1, %v132_v22 }
 0x18f   :  { %v389_v26 = vpop.f32.mrf.mxu1 }
 0x190   :  { %v242_v33 = vadd.f32 %v389_v26, %v145_v29 }
 0x191   :  { %v236_v27 = vpop.f32.mrf.mxu1 }
 0x192   :  { %v237_v36 = vadd.f32 %v236_v27, %v140_v31  ;;  %v256_v38 = vmax.f32 %v242_v33, 0.0 }
 0x193   :  { %v392_v28 = vpop.f32.mrf.mxu1 }
 0x194   :  { %v252_v30 = vadd.f32 %v392_v28, %v155_v24  ;;  %v255_v39 = vmax.f32 %v237_v36, 0.0 }
 0x195   :  { %v246_v32 = vpop.f32.mrf.mxu1 }
 0x196   :  { %v258_v34 = vmax.f32 %v252_v30, 0.0  ;;  %v247_v35 = vadd.f32 %v246_v32, %v150_v25 }
 0x198   :  { %v257_v37 = vmax.f32 %v247_v35, 0.0  ;;  %394 = vmatpush3.msra.mxu0 %v258_v34 }
 0x199   :  { %395 = vmatprep.subr.mxu0 %v433_v23 }
 0x19a   :  { %396 = vmatpush3.msra.mxu0 %v257_v37 }
 0x19b   :  { %397 = vmatprep.subr.mxu0 %v433_v23 }
 0x19c   :  { %398 = vmatpush3.msra.mxu0 %v256_v38 }
 0x19d   :  { %399 = vmatprep.subr.mxu0 %v433_v23 }
 0x19e   :  { %400 = vmatpush3.msra.mxu0 %v255_v39 }
 0x19f   :  { %402 = vmatmul.mubr.msk.f32.vlgmr.msra.gmra.mxu0 %vm266_vm3, %v259_v40 }
 0x25f   :  { %v336_v42 = vpop.f32.mrf.mxu0 }
 0x260   :  { %v337_v43 = vadd.f32 %v336_v42, %v264_v41 }
 0x261   :  { %v403_v44 = vpop.f32.mrf.mxu0 }
 0x262   :  { %341 = vst.msk [vmem:[#allocation2] sm:$0xf] %vm340_vm4, %v337_v43 }
 0x263   :  { %421 = shalt.err (!%p418_p4)
}
 0x264   :  { %351 = dma.vmem_to_hbm [thread:$0]  %s349_s26, 64, %s535_s7, [#allocation3]  }
 0x265   :  { %430 = dma.done.wait [#allocation3], 64  }
 0x266   :  { %431 = vsyncadd [#allocation3], 4294967232 }
 0x267   :  { %355 = vsyncpa [#allocation3], 1 }

</bundles_post_ra>
